<compile_context>
chip_gen: v5e
topology: v5e:2x2
jax: 0.10.0
libtpu: 0.0.40
codegen_flags: <defaults>
</compile_context>

<pallas_src>
import jax
import jax.numpy as jnp
from jax.experimental import pallas as pl
from jax.experimental.pallas import tpu as pltpu

_LANES = 128
_SUBLANES = 8


def _round_up(n, m):
    return ((n + m - 1) // m) * m


def _make_banknet_kernel(layer_meta):
    """layer_meta: tuple of (w_row_offset, in_dim, out_dim, b_row_offset)."""
    n_layers = len(layer_meta)

    def kernel(x_ref, p_ref, out_ref):
        h = x_ref[...]                      # [TB, F] f32 (already f32, no cast)
        p = p_ref[...]                      # [rows, 128] packed params (VMEM-resident)
        for li, (w_off, in_dim, out_dim, b_off) in enumerate(layer_meta):
            w = p[w_off:w_off + in_dim, :out_dim]      # static slice -> [in, out]
            b = p[b_off:b_off + 1, :out_dim]           # static slice -> [1, out]
            y = jnp.dot(h, w, preferred_element_type=jnp.float32) + b
            if li < n_layers - 1:
                y = jnp.maximum(y, 0.0)                # ReLU on fc1..fc5
            h = y
        # TODO(synk): if the consumer applies softmax/argmax on the [B,2]
        # logits, fuse it here instead of launching another op.
        out_ref[...] = h.astype(out_ref.dtype)

    return kernel


def pack_banknet_params(params):
    """Pack [(W[in,out], b[1,out]), ...] into one [rows,128] f32 slab + static metadata."""
    slabs = []
    meta = []
    cur = 0
    for (w, b) in params:
        in_dim, out_dim = w.shape
        w_rows = _round_up(in_dim, _SUBLANES)
        b_rows = _SUBLANES
        w_pad = jnp.zeros((w_rows, _LANES), jnp.float32)
        w_pad = w_pad.at[:in_dim, :out_dim].set(w.astype(jnp.float32))
        b_pad = jnp.zeros((b_rows, _LANES), jnp.float32)
        b_pad = b_pad.at[:1, :out_dim].set(jnp.reshape(b, (1, out_dim)).astype(jnp.float32))
        slabs.append(w_pad)
        slabs.append(b_pad)
        meta.append((cur, in_dim, out_dim, cur + w_rows))
        cur += w_rows + b_rows
    slab = jnp.concatenate(slabs, axis=0)
    return slab, tuple(meta)


def banknet_forward(x, params, *, block_b=1024):
    """x: [B, ...] -> flattened to [B, F]. params: list of (W[in,out], b[1,out])."""
    x = jnp.asarray(x, jnp.float32)
    if x.ndim > 2:
        x = x.reshape(x.shape[0], -1)       # torch.flatten(x, 1)
    B, F = x.shape
    out_dim = params[-1][0].shape[1]        # 2

    slab, meta = pack_banknet_params(params)

    # Batch tile: multiple of 8 (sublane), capped at block_b (e.g. 1024 rows f32).
    TB = min(_round_up(block_b, _SUBLANES), _round_up(B, _SUBLANES))
    n_blocks = pl.cdiv(B, TB)
    padded_B = n_blocks * TB
    if padded_B != B:
        x = jnp.pad(x, ((0, padded_B - B), (0, 0)))

    kernel = _make_banknet_kernel(meta)

    out = pl.pallas_call(
        kernel,
        out_shape=jax.ShapeDtypeStruct((padded_B, out_dim), jnp.float32),
        grid=(n_blocks,),
        in_specs=[
            pl.BlockSpec((TB, F), lambda i: (i, 0)),          # x: batch-tiled
            pl.BlockSpec(slab.shape, lambda i: (0, 0)),       # params: resident
        ],
        out_specs=pl.BlockSpec((TB, out_dim), lambda i: (i, 0)),
        compiler_params=pltpu.CompilerParams(
            dimension_semantics=("parallel",),                # shard batch across TCs (v7x)
        ),
    )(x, slab)
    return out[:B]


def init_banknet_params(num_of_features, key):
    """PyTorch nn.Linear-style init: U(-1/sqrt(fan_in), 1/sqrt(fan_in))."""
    dims = [num_of_features, 64, 32, 16, 8, 4, 2]
    params = []
    for i in range(len(dims) - 1):
        fan_in, fan_out = dims[i], dims[i + 1]
        key, kw, kb = jax.random.split(key, 3)
        bound = 1.0 / jnp.sqrt(jnp.float32(fan_in))
        w = jax.random.uniform(kw, (fan_in, fan_out), jnp.float32, -bound, bound)
        b = jax.random.uniform(kb, (1, fan_out), jnp.float32, -bound, bound)
        params.append((w, b))
    return params


def banknet_reference(x, params):
    h = x.reshape(x.shape[0], -1)
    for i, (w, b) in enumerate(params):
        h = h @ w + b
        if i < len(params) - 1:
            h = jnp.maximum(h, 0.0)
    return h


if __name__ == "__main__":
    key = jax.random.PRNGKey(0)
    kp, kx, kx2 = jax.random.split(key, 3)

    num_of_features = 20     # e.g. bank-marketing tabular features
    params = init_banknet_params(num_of_features, kp)

    # Small batch: single grid step.
    x_small = jax.random.normal(kx, (8, num_of_features), jnp.float32)
    out_small = jax.block_until_ready(banknet_forward(x_small, params))
    ref_small = banknet_reference(x_small, params)
    assert out_small.shape == (8, 2)
    assert jnp.allclose(out_small, ref_small, atol=1e-5, rtol=1e-5), "mismatch (small batch)"

    # Larger batch with a non-dividing tile: exercises multi-step grid,
    # padding/masked writeback, and the parallel batch axis.
    x_big = jax.random.normal(kx2, (300, num_of_features), jnp.float32)
    out_big = jax.block_until_ready(banknet_forward(x_big, params, block_b=128))
    ref_big = banknet_reference(x_big, params)
    assert out_big.shape == (300, 2)
    assert jnp.allclose(out_big, ref_big, atol=1e-5, rtol=1e-5), "mismatch (tiled batch)"

    print("KERNEL_OK")
</pallas_src>

<mosaic_0001>
module attributes {stable_mosaic.version = 11 : i64} {
  func.func @kernel(%arg0: i32, %arg1: memref<8x20xf32, #tpu.memory_space<vmem>>, %arg2: memref<200x128xf32, #tpu.memory_space<vmem>>, %arg3: memref<8x2xf32, #tpu.memory_space<vmem>>) attributes {dimension_semantics = [#tpu.dimension_semantics<parallel>], iteration_bounds = array<i64: 1>, scalar_prefetch = 0 : i64, scratch_operands = 0 : i64, tpu.core_type = #tpu.core_type<tc>, window_params = [{transform_indices = @transform_0, window_bounds = array<i64: 8, 20>}, {pipeline_mode = #tpu.pipeline_mode<synchronous>, transform_indices = @transform_1, window_bounds = array<i64: 200, 128>}, {transform_indices = @transform_2, window_bounds = array<i64: 8, 2>}]} {
    %c0 = arith.constant 0 : index
    %c0_0 = arith.constant 0 : index
    %0 = vector.load %arg1[%c0, %c0_0] : memref<8x20xf32, #tpu.memory_space<vmem>>, vector<8x20xf32>
    %c0_1 = arith.constant 0 : index
    %c0_2 = arith.constant 0 : index
    %1 = vector.load %arg2[%c0_1, %c0_2] : memref<200x128xf32, #tpu.memory_space<vmem>>, vector<200x128xf32>
    %2 = vector.extract_strided_slice %1 {offsets = [0, 0], sizes = [20, 64], strides = [1, 1]} : vector<200x128xf32> to vector<20x64xf32>
    %3 = vector.extract_strided_slice %1 {offsets = [24, 0], sizes = [1, 64], strides = [1, 1]} : vector<200x128xf32> to vector<1x64xf32>
    %cst = arith.constant dense<0.000000e+00> : vector<8x64xf32>
    %4 = tpu.matmul %0, %2, %cst {dimension_numbers = #tpu.dot_dimension_numbers<[1], [0], [0], [1], [0, 0, 1, 1], [], []>} : vector<8x20xf32>, vector<20x64xf32>, vector<8x64xf32> -> vector<8x64xf32>
    %5 = vector.broadcast %3 : vector<1x64xf32> to vector<8x64xf32>
    %6 = arith.addf %4, %5 : vector<8x64xf32>
    %cst_3 = arith.constant 0.000000e+00 : f32
    %7 = vector.broadcast %cst_3 : f32 to vector<8x64xf32>
    %8 = arith.maximumf %6, %7 : vector<8x64xf32>
    %9 = vector.extract_strided_slice %1 {offsets = [32, 0], sizes = [64, 32], strides = [1, 1]} : vector<200x128xf32> to vector<64x32xf32>
    %10 = vector.extract_strided_slice %1 {offsets = [96, 0], sizes = [1, 32], strides = [1, 1]} : vector<200x128xf32> to vector<1x32xf32>
    %cst_4 = arith.constant dense<0.000000e+00> : vector<8x32xf32>
    %11 = tpu.matmul %8, %9, %cst_4 {dimension_numbers = #tpu.dot_dimension_numbers<[1], [0], [0], [1], [0, 0, 1, 1], [], []>} : vector<8x64xf32>, vector<64x32xf32>, vector<8x32xf32> -> vector<8x32xf32>
    %12 = vector.broadcast %10 : vector<1x32xf32> to vector<8x32xf32>
    %13 = arith.addf %11, %12 : vector<8x32xf32>
    %cst_5 = arith.constant 0.000000e+00 : f32
    %14 = vector.broadcast %cst_5 : f32 to vector<8x32xf32>
    %15 = arith.maximumf %13, %14 : vector<8x32xf32>
    %16 = vector.extract_strided_slice %1 {offsets = [104, 0], sizes = [32, 16], strides = [1, 1]} : vector<200x128xf32> to vector<32x16xf32>
    %17 = vector.extract_strided_slice %1 {offsets = [136, 0], sizes = [1, 16], strides = [1, 1]} : vector<200x128xf32> to vector<1x16xf32>
    %cst_6 = arith.constant dense<0.000000e+00> : vector<8x16xf32>
    %18 = tpu.matmul %15, %16, %cst_6 {dimension_numbers = #tpu.dot_dimension_numbers<[1], [0], [0], [1], [0, 0, 1, 1], [], []>} : vector<8x32xf32>, vector<32x16xf32>, vector<8x16xf32> -> vector<8x16xf32>
    %19 = vector.broadcast %17 : vector<1x16xf32> to vector<8x16xf32>
    %20 = arith.addf %18, %19 : vector<8x16xf32>
    %cst_7 = arith.constant 0.000000e+00 : f32
    %21 = vector.broadcast %cst_7 : f32 to vector<8x16xf32>
    %22 = arith.maximumf %20, %21 : vector<8x16xf32>
    %23 = vector.extract_strided_slice %1 {offsets = [144, 0], sizes = [16, 8], strides = [1, 1]} : vector<200x128xf32> to vector<16x8xf32>
    %24 = vector.extract_strided_slice %1 {offsets = [160, 0], sizes = [1, 8], strides = [1, 1]} : vector<200x128xf32> to vector<1x8xf32>
    %cst_8 = arith.constant dense<0.000000e+00> : vector<8x8xf32>
    %25 = tpu.matmul %22, %23, %cst_8 {dimension_numbers = #tpu.dot_dimension_numbers<[1], [0], [0], [1], [0, 0, 1, 1], [], []>} : vector<8x16xf32>, vector<16x8xf32>, vector<8x8xf32> -> vector<8x8xf32>
    %26 = vector.broadcast %24 : vector<1x8xf32> to vector<8x8xf32>
    %27 = arith.addf %25, %26 : vector<8x8xf32>
    %cst_9 = arith.constant 0.000000e+00 : f32
    %28 = vector.broadcast %cst_9 : f32 to vector<8x8xf32>
    %29 = arith.maximumf %27, %28 : vector<8x8xf32>
    %30 = vector.extract_strided_slice %1 {offsets = [168, 0], sizes = [8, 4], strides = [1, 1]} : vector<200x128xf32> to vector<8x4xf32>
    %31 = vector.extract_strided_slice %1 {offsets = [176, 0], sizes = [1, 4], strides = [1, 1]} : vector<200x128xf32> to vector<1x4xf32>
    %cst_10 = arith.constant dense<0.000000e+00> : vector<8x4xf32>
    %32 = tpu.matmul %29, %30, %cst_10 {dimension_numbers = #tpu.dot_dimension_numbers<[1], [0], [0], [1], [0, 0, 1, 1], [], []>} : vector<8x8xf32>, vector<8x4xf32>, vector<8x4xf32> -> vector<8x4xf32>
    %33 = vector.broadcast %31 : vector<1x4xf32> to vector<8x4xf32>
    %34 = arith.addf %32, %33 : vector<8x4xf32>
    %cst_11 = arith.constant 0.000000e+00 : f32
    %35 = vector.broadcast %cst_11 : f32 to vector<8x4xf32>
    %36 = arith.maximumf %34, %35 : vector<8x4xf32>
    %37 = vector.extract_strided_slice %1 {offsets = [184, 0], sizes = [4, 2], strides = [1, 1]} : vector<200x128xf32> to vector<4x2xf32>
    %38 = vector.extract_strided_slice %1 {offsets = [192, 0], sizes = [1, 2], strides = [1, 1]} : vector<200x128xf32> to vector<1x2xf32>
    %cst_12 = arith.constant dense<0.000000e+00> : vector<8x2xf32>
    %39 = tpu.matmul %36, %37, %cst_12 {dimension_numbers = #tpu.dot_dimension_numbers<[1], [0], [0], [1], [0, 0, 1, 1], [], []>} : vector<8x4xf32>, vector<4x2xf32>, vector<8x2xf32> -> vector<8x2xf32>
    %40 = vector.broadcast %38 : vector<1x2xf32> to vector<8x2xf32>
    %41 = arith.addf %39, %40 : vector<8x2xf32>
    %c0_13 = arith.constant 0 : index
    %c0_14 = arith.constant 0 : index
    %42 = vector.load %arg3[%c0_13, %c0_14] : memref<8x2xf32, #tpu.memory_space<vmem>>, vector<8x2xf32>
    tpu.vector_store %arg3[%c0_13, %c0_14], %41 {strides = array<i32>} : memref<8x2xf32, #tpu.memory_space<vmem>>, vector<8x2xf32>,
    return
  }
  func.func @transform_0(%arg0: i32) -> (i32, i32) {
    %c0_i32 = arith.constant 0 : i32
    %c0_i32_0 = arith.constant 0 : i32
    return %arg0, %c0_i32 : i32, i32
  }
  func.func @transform_1(%arg0: i32) -> (i32, i32) {
    %c0_i32 = arith.constant 0 : i32
    %c0_i32_0 = arith.constant 0 : i32
    %c0_i32_1 = arith.constant 0 : i32
    return %c0_i32, %c0_i32_0 : i32, i32
  }
  func.func @transform_2(%arg0: i32) -> (i32, i32) {
    %c0_i32 = arith.constant 0 : i32
    %c0_i32_0 = arith.constant 0 : i32
    return %arg0, %c0_i32 : i32, i32
  }
}

</mosaic_0001>

<bundles_post_ra>
// kernel: tpu_custom_call.1
= control target key start
LH: loop header
LB: loop body
LE: loop exit
PB: predicated region body
PF: predicated region fallthrough
CT: control target
= control target key end

     0   :  { %7 = vsyncpa [#allocation3], 0  ;;  %s331_s0 = inlined_call_operand.hbm [shape: f32[8,20], index: 0, kind: input, shape index: {}]   ;;  %s332_s1 = inlined_call_operand.hbm [shape: f32[200,128], index: 1, kind: input, shape index: {}]   ;;  %s333_s2 = inlined_call_operand.vmem [shape: f32[8,2], index: 2, kind: output, shape index: {}]  }
   0x1   :  { %s14_s11 = sshll.u32 %s331_s0, 4  ;;  %s15_s11 = int_to_ptr.hbm [resolvable:$true] %s14_s11 }
   0x2   :  { %8 = vsyncpa [#allocation5], 0  ;;  %s301_s12 = smov [#allocation2]   ;;  %s24_s16 = sshll.u32 %s332_s1, 4  ;;  %s25_s16 = int_to_ptr.hbm [resolvable:$true] %s24_s16 }
   0x3   :  { %s16_s13 = sshll.u32 %s301_s12, 4  ;;  %s302_s17 = smov [#allocation4]   ;;  %s17_s13 = int_to_ptr.vmem [resolvable:$true] %s16_s13 }
   0x4   :  { %19 = dma.hbm_to_vmem [thread:$0]  %s15_s11, 128, %s17_s13, [#allocation3]  }
   0x5   :  { %s26_s18 = sshll.u32 %s302_s17, 4  ;;  %s303_s19 = smov 128   ;;  %s27_s18 = int_to_ptr.vmem [resolvable:$true] %s26_s18 }
   0x6   :  { %s304_s20 = smov 8  }
   0x7   :  { %32 = dma.hbm_to_vmem [thread:$0]  %s25_s16, 3200, %s27_s18, [#allocation5], %s303_s19, %s303_s19, %s304_s20  }
   0x8   :  { %297 = dma.done.wait [#allocation3], 128  }
   0x9   :  { %298 = vsyncadd [#allocation3], 4294967168 }
   0xa   :  { %299 = dma.done.wait [#allocation5], 3200  }
   0xb   :  { %300 = vsyncadd [#allocation5], 4294964096  ;;  %vm72_vm0 = vcmask 1043456   ;;  %v44_v0 = vld [vmem:[#allocation4 + $0x10] sm:$0xff]  ;;  %v43_v1 = vld [vmem:[#allocation4 + $0x8] sm:$0xff]  ;;  %vm68_vm1 = vcmask 162816  }
   0xc   :  { %237 = vmatpush.msk.msra.mxu0 %vm72_vm0, %v44_v0  ;;  %v53_v2 = vld [vmem:[#allocation4 + $0x58] sm:$0xff]  ;;  %v52_v3 = vld [vmem:[#allocation4 + $0x50] sm:$0xff]  ;;  %v42_v4 = vld [vmem:[#allocation4] sm:$0xff]  ;;  %vm98_vm2 = vcmask 523264   ;;  %vm124_vm3 = vcmask 261120   ;;  %vm150_vm4 = vcmask 130048  }
   0xd   :  { %110 = vmatpush.msra.mxu1 %v53_v2  ;;  %v41_v5 = vld [vmem:[#allocation2] sm:$0xff]  ;;  %v51_v6 = vld [vmem:[#allocation4 + $0x48] sm:$0xff]  ;;  %v50_v7 = vld [vmem:[#allocation4 + $0x40] sm:$0xff]  ;;  %vm176_vm5 = vcmask 64512   ;;  %vm202_vm6 = vcmask 31744   ;;  %vm229_vm7 = vcmask 15360  }
   0xe   :  { %90 = vmatpush.msra.mxu0 %v43_v1  ;;  %v49_v8 = vld [vmem:[#allocation4 + $0x38] sm:$0xff]  ;;  %v48_v9 = vld [vmem:[#allocation4 + $0x30] sm:$0xff]  ;;  %v47_v10 = vld [vmem:[#allocation4 + $0x28] sm:$0xff] }
   0xf   :  { %111 = vmatpush.msra.mxu1 %v52_v3  ;;  %v46_v11 = vld [vmem:[#allocation4 + $0x20] sm:$0xff]  ;;  %v45_v13 = vld [vmem:[#allocation4 + $0x18] sm:$0xff]  ;;  %v56_v19 = vld [vmem:[#allocation4 + $0x70] sm:$0xff] }
  0x10   :  { %91 = vmatpush.msra.mxu0 %v42_v4  ;;  %v58_v12 = vld [vmem:[#allocation4 + $0x80] sm:$0xff]  ;;  %v67_v14 = vperm.slane %v45_v13, 0  ;;  %v57_v18 = vld [vmem:[#allocation4 + $0x78] sm:$0xff]  ;;  %v55_v20 = vld [vmem:[#allocation4 + $0x68] sm:$0xff] }
  0x11   :  { %238 = vmatmul.msk.f32.vlgmr.msra.gmra.mxu0 %vm68_vm1, %v41_v5  ;;  %112 = vmatpush.msra.mxu1 %v51_v6  ;;  %v54_v21 = vld [vmem:[#allocation4 + $0x60] sm:$0xff]  ;;  %v61_v26 = vld [vmem:[#allocation4 + $0x98] sm:$0xff]  ;;  %v60_v27 = vld [vmem:[#allocation4 + $0x90] sm:$0xff] }
  0x12   :  { %140 = vmatpush.msra.mxu2 %v58_v12  ;;  %v97_v22 = vperm.slane %v54_v21, 0  ;;  %168 = vmatpush.msra.mxu3 %v61_v26  ;;  %v63_v28 = vld [vmem:[#allocation4 + $0xa8] sm:$0xff]  ;;  %v65_v34 = vld [vmem:[#allocation4 + $0xb8] sm:$0xff]  ;;  %v62_v35 = vld [vmem:[#allocation4 + $0xa0] sm:$0xff] }
  0x13   :  { %113 = vmatpush.msra.mxu1 %v50_v7  ;;  %v59_v29 = vld [vmem:[#allocation4 + $0x88] sm:$0xff]  ;;  %243 = vmatpush.msk.msrb.mxu0 %vm72_vm0, %v65_v34  ;;  %v149_v36 = vperm.slane %v62_v35, 0  ;;  %v64_v40 = vld [vmem:[#allocation4 + $0xb0] sm:$0xff]  ;;  %v66_v45 = vld [vmem:[#allocation4 + $0xc0] sm:$0xff] }
  0x14   :  { %141 = vmatpush.msra.mxu2 %v57_v18  ;;  %169 = vmatpush.msra.mxu3 %v60_v27  ;;  %v123_v30 = vperm.slane %v59_v29, 0  ;;  %v175_v41 = vperm.slane %v64_v40, 0  ;;  %v201_v46 = vperm.slane %v66_v45, 0 }
  0x15   :  { %114 = vmatpush.msra.mxu1 %v49_v8 }
  0x16   :  { %142 = vmatpush.msra.mxu2 %v56_v19  ;;  %195 = vmatpush.msrb.mxu3 %v63_v28 }
  0x17   :  { %115 = vmatpush.msra.mxu1 %v48_v9 }
  0x18   :  { %143 = vmatpush.msra.mxu2 %v55_v20 }
  0x19   :  { %116 = vmatpush.msra.mxu1 %v47_v10 }
  0x1b   :  { %117 = vmatpush.msra.mxu1 %v46_v11 }
  0x8e   :  { %v93_v15 = vpop.f32.mrf.mxu0 }
  0x8f   :  { %v94_v16 = vadd.f32 %v93_v15, %v67_v14 }
  0x91   :  { %v96_v17 = vmax.f32 %v94_v16, 0.0 }
  0x93   :  { %239 = vmatmul.msk.f32.vlgmr.msra.gmra.mxu1 %vm98_vm2, %v96_v17 }
 0x110   :  { %v119_v23 = vpop.f32.mrf.mxu1 }
 0x111   :  { %v120_v24 = vadd.f32 %v119_v23, %v97_v22 }
 0x113   :  { %v122_v25 = vmax.f32 %v120_v24, 0.0 }
 0x115   :  { %240 = vmatmul.msk.f32.vlgmr.msra.gmra.mxu2 %vm124_vm3, %v122_v25 }
 0x198   :  { %v145_v31 = vpop.f32.mrf.mxu2 }
 0x199   :  { %v146_v32 = vadd.f32 %v145_v31, %v123_v30 }
 0x19b   :  { %v148_v33 = vmax.f32 %v146_v32, 0.0 }
 0x19d   :  { %241 = vmatmul.msk.f32.vlgmr.msra.gmra.mxu3 %vm150_vm4, %v148_v33 }
 0x220   :  { %v171_v37 = vpop.f32.mrf.mxu3 }
 0x221   :  { %v172_v38 = vadd.f32 %v171_v37, %v149_v36 }
 0x223   :  { %v174_v39 = vmax.f32 %v172_v38, 0.0 }
 0x225   :  { %242 = vmatmul.msk.f32.vlgmr.msrb.gmra.mxu3 %vm176_vm5, %v174_v39 }
 0x2a8   :  { %v197_v42 = vpop.f32.mrf.mxu3 }
 0x2a9   :  { %v198_v43 = vadd.f32 %v197_v42, %v175_v41 }
 0x2ab   :  { %v200_v44 = vmax.f32 %v198_v43, 0.0 }
 0x2ad   :  { %244 = vmatmul.msk.f32.vlgmr.msrb.gmra.mxu0 %vm202_vm6, %v200_v44 }
 0x32a   :  { %v226_v47 = vpop.f32.mrf.mxu0 }
 0x32b   :  { %v227_v48 = vadd.f32 %v226_v47, %v201_v46 }
 0x32d   :  { %230 = vst.msk [vmem:[%s333_s2] sm:$0xff] %vm229_vm7, %v227_v48 }
 0x32e   :  { %235 = vsyncpa [#allocation3], 1 }
 0x32f   :  { %236 = vsyncpa [#allocation5], 1 }

</bundles_post_ra>
